<compile_context>
chip_gen: v7x
topology: tpu7x:2x2x1
jax: 0.10.0
libtpu: 0.0.40
codegen_flags: <defaults>
</compile_context>

<pallas_src>
import math

import jax
import jax.numpy as jnp
from jax import lax
from jax.experimental import pallas as pl
from jax.experimental.pallas import tpu as pltpu


# ----------------------------------------------------------------------------
# Pallas kernel: fused L2-normalize (over channels) + 1x1 conv (matmul + bias)
# ----------------------------------------------------------------------------
def _norm_conv1x1_kernel(x_ref, w_ref, b_ref, o_ref):
    # x_ref: (tm, C)  tile of patch tokens, channels-last (bf16/f32; upcast here)
    # w_ref: (2, C)   conv weight, PyTorch (out, in) layout with the 1x1 kernel squeezed
    # b_ref: (2,)     conv bias, in SMEM (read as scalars in the epilogue)
    # o_ref: (2, tm)  lane-dense output tile
    x = x_ref[...].astype(jnp.float32)            # upcast in-register (HBM read stays bf16)
    w = w_ref[...].astype(jnp.float32)

    # Project first, normalize after. Both matmuls are the "A @ B^T" (transposed-rhs)
    # MXU pattern so results are lane-dense (rows, tm). MXU has huge slack here (N=2),
    # so the extra ones-matmul that produces the per-token squared norms is free.
    y = lax.dot_general(w, x, (((1,), (1,)), ((), ())),
                        preferred_element_type=jnp.float32)           # (2, tm)
    ones_row = jnp.ones((1, x.shape[1]), jnp.float32)
    sq = lax.dot_general(ones_row, x * x, (((1,), (1,)), ((), ())),
                         preferred_element_type=jnp.float32)          # (1, tm)

    # F.normalize(eps=1e-12): x / max(||x||, 1e-12) == x * rsqrt(max(||x||^2, 1e-24))
    inv = lax.rsqrt(jnp.maximum(sq, 1e-24))                           # EUP slot, (1, tm)
    out = y * inv                                                     # (2, tm)

    # Bias folded into the store epilogue from SMEM scalars.
    o_ref[0:1, :] = (out[0:1, :] + b_ref[0]).astype(o_ref.dtype)
    o_ref[1:2, :] = (out[1:2, :] + b_ref[1]).astype(o_ref.dtype)


def _pick_tile_rows(M, C, in_itemsize, tm_req):
    """Largest row tile fitting a conservative VMEM budget (v7x: 64 MiB/TC), while
    keeping a few grid steps for megacore sharding / pipeline depth."""
    budget = 40 * 1024 * 1024
    # dbl-buffered input tile + f32 upcast & x*x temporaries + dbl-buffered output rows
    per_row = C * (2 * in_itemsize + 2 * 4) + 2 * 2 * 4
    tm = min(int(tm_req), max(128, budget // per_row))
    # keep >= ~4 grid steps when possible (v7x has 2 TensorCores + pipeline depth),
    # but never shrink below 256 rows for that reason (per-step overhead dominates).
    while tm > 256 and (M + tm - 1) // tm < 4:
        tm //= 2
    return max(128, (tm // 128) * 128)


def norm_conv1x1(features_bhwc, weight_oc, bias_o, *, tm=1024):
    """features_bhwc: (B, Hp, Wp, C) channels-last patch features (bf16 or f32).
    weight_oc: (2, C) 1x1-conv weight (PyTorch (out,in) layout); bias_o: (2,).
    Returns predictions in NCHW: (B, 2, Hp, Wp), float32."""
    B, Hp, Wp, C = features_bhwc.shape
    M = B * Hp * Wp
    x = features_bhwc.reshape(M, C)

    in_itemsize = jnp.dtype(x.dtype).itemsize
    tm = _pick_tile_rows(M, C, in_itemsize, tm)
    n_steps = (M + tm - 1) // tm
    M_pad = n_steps * tm
    if M_pad != M:
        # zero-pad extra tokens; they produce finite values and are sliced off below
        x = jnp.pad(x, ((0, M_pad - M), (0, 0)))

    w = weight_oc.reshape(2, C).astype(jnp.float32)
    b = bias_o.reshape(2).astype(jnp.float32)

    # Explicit VMEM limit with headroom (v7x has only 64 MiB/TC; don't rely on defaults).
    vmem_need = tm * (C * (2 * in_itemsize + 2 * 4) + 2 * 2 * 4) + 64 * 1024
    vmem_limit = int(min(48 * 1024 * 1024, max(2 * vmem_need, 16 * 1024 * 1024)))

    out = pl.pallas_call(
        _norm_conv1x1_kernel,
        out_shape=jax.ShapeDtypeStruct((2, M_pad), jnp.float32),
        grid_spec=pltpu.PrefetchScalarGridSpec(
            num_scalar_prefetch=0,
            grid=(n_steps,),
            in_specs=[
                pl.BlockSpec((tm, C), lambda i: (i, 0)),
                pl.BlockSpec((2, C), lambda i: (0, 0)),
                pl.BlockSpec(memory_space=pltpu.MemorySpace.SMEM),
            ],
            out_specs=pl.BlockSpec((2, tm), lambda i: (0, i)),
        ),
        compiler_params=pltpu.CompilerParams(
            dimension_semantics=("parallel",),
            vmem_limit_bytes=vmem_limit,
        ),
    )(x, w, b)

    out = out[:, :M]                                        # drop padded tokens
    return out.reshape(2, B, Hp, Wp).transpose(1, 0, 2, 3)  # NCHW (B, 2, Hp, Wp)


# ----------------------------------------------------------------------------
# Glue: deterministic stand-in for the (frozen, external) RADIO ViT backbone.
# It only needs to produce (B, Hp, Wp, C) patch-token features.
# TODO(synk): the pretrained RADIO VisionTransformer backbone has no in-script
# Pallas equivalent; it is stubbed with a deterministic linear patch embedding.
# ----------------------------------------------------------------------------
def stub_forward_features(x_nchw, patch_embed_w, patch_size):
    B, Cin, H, W = x_nchw.shape
    Hp, Wp = math.ceil(H / patch_size), math.ceil(W / patch_size)
    x = x_nchw.reshape(B, Cin, Hp, patch_size, Wp, patch_size)
    x = x.transpose(0, 2, 4, 1, 3, 5).reshape(B, Hp, Wp, Cin * patch_size * patch_size)
    feats = jnp.einsum("bhwp,pc->bhwc", x, patch_embed_w)   # (B, Hp, Wp, C)
    # Backbone emits bf16 features; keep them bf16 in HBM (halves kernel read traffic).
    return feats.astype(jnp.bfloat16)


def position_predictor_forward(x_nchw, params):
    feats = stub_forward_features(x_nchw, params["patch_embed_w"], params["patch_size"])
    return norm_conv1x1(feats, params["conv_w"], params["conv_b"])


# ----------------------------------------------------------------------------
# Reference (pure JAX) for correctness check — consumes the same bf16 features.
# ----------------------------------------------------------------------------
def reference_forward(x_nchw, params):
    feats = stub_forward_features(x_nchw, params["patch_embed_w"], params["patch_size"])
    f = feats.astype(jnp.float32).transpose(0, 3, 1, 2)     # NCHW
    nrm = jnp.maximum(jnp.sqrt(jnp.sum(f * f, axis=1, keepdims=True)), 1e-12)
    fn = f / nrm
    y = jnp.einsum("bchw,oc->bohw", fn, params["conv_w"]) \
        + params["conv_b"][None, :, None, None]
    return y


if __name__ == "__main__":
    key = jax.random.PRNGKey(0)
    k_x, k_pe, k_w, k_b = jax.random.split(key, 4)

    B, Cin, H, W = 2, 3, 64, 64
    patch_size = 4
    embed_dim = 32                      # ViT embed_dim (feature channels); small demo size

    x = jax.random.normal(k_x, (B, Cin, H, W), dtype=jnp.float32)

    params = {
        "patch_size": patch_size,
        "patch_embed_w": 0.02 * jax.random.normal(
            k_pe, (Cin * patch_size * patch_size, embed_dim), dtype=jnp.float32),
        # Conv2d(embed_dim, 2, kernel_size=1) weight in PyTorch (out, in) layout + bias
        "conv_w": 0.1 * jax.random.normal(k_w, (2, embed_dim), dtype=jnp.float32),
        "conv_b": 0.1 * jax.random.normal(k_b, (2,), dtype=jnp.float32),
    }

    out = jax.block_until_ready(position_predictor_forward(x, params))
    ref = jax.block_until_ready(reference_forward(x, params))

    assert out.shape == (B, 2, H // patch_size, W // patch_size), out.shape
    assert jnp.all(jnp.isfinite(out)), "non-finite output"
    assert jnp.allclose(out, ref, atol=1e-4, rtol=1e-4), float(jnp.max(jnp.abs(out - ref)))

    print("KERNEL_OK")
</pallas_src>

<mosaic_0001>
module attributes {stable_mosaic.version = 11 : i64} {
  func.func @_norm_conv1x1_kernel(%arg0: i32, %arg1: memref<256x32xbf16, #tpu.memory_space<vmem>>, %arg2: memref<2x32xf32, #tpu.memory_space<vmem>>, %arg3: memref<2xf32, #tpu.memory_space<smem>>, %arg4: memref<2x256xf32, #tpu.memory_space<vmem>>) attributes {dimension_semantics = [#tpu.dimension_semantics<parallel>], iteration_bounds = array<i64: 2>, scalar_prefetch = 0 : i64, scratch_operands = 0 : i64, tpu.core_type = #tpu.core_type<tc>, window_params = [{transform_indices = @transform_0, window_bounds = array<i64: 256, 32>}, {pipeline_mode = #tpu.pipeline_mode<synchronous>, transform_indices = @transform_1, window_bounds = array<i64: 2, 32>}, {transform_indices = @transform_2, window_bounds = array<i64: 2>}, {transform_indices = @transform_3, window_bounds = array<i64: 2, 256>}]} {
    %c0 = arith.constant 0 : index
    %c0_0 = arith.constant 0 : index
    %0 = vector.load %arg1[%c0, %c0_0] : memref<256x32xbf16, #tpu.memory_space<vmem>>, vector<256x32xbf16>
    %1 = arith.extf %0 : vector<256x32xbf16> to vector<256x32xf32>
    %c0_1 = arith.constant 0 : index
    %c0_2 = arith.constant 0 : index
    %2 = vector.load %arg2[%c0_1, %c0_2] : memref<2x32xf32, #tpu.memory_space<vmem>>, vector<2x32xf32>
    %cst = arith.constant dense<0.000000e+00> : vector<2x256xf32>
    %3 = tpu.matmul %2, %1, %cst {dimension_numbers = #tpu.dot_dimension_numbers<[1], [1], [0], [0], [0, 0, 1, 0], [], []>} : vector<2x32xf32>, vector<256x32xf32>, vector<2x256xf32> -> vector<2x256xf32>
    %cst_3 = arith.constant 1.000000e+00 : f32
    %4 = vector.broadcast %cst_3 : f32 to vector<1x32xf32>
    %5 = arith.mulf %1, %1 : vector<256x32xf32>
    %cst_4 = arith.constant dense<0.000000e+00> : vector<1x256xf32>
    %6 = tpu.matmul %4, %5, %cst_4 {dimension_numbers = #tpu.dot_dimension_numbers<[1], [1], [0], [0], [0, 0, 1, 0], [], []>} : vector<1x32xf32>, vector<256x32xf32>, vector<1x256xf32> -> vector<1x256xf32>
    %cst_5 = arith.constant 1.000000e-24 : f32
    %7 = vector.broadcast %cst_5 : f32 to vector<1x256xf32>
    %8 = arith.maximumf %6, %7 : vector<1x256xf32>
    %9 = math.rsqrt %8 : vector<1x256xf32>
    %10 = vector.broadcast %9 : vector<1x256xf32> to vector<2x256xf32>
    %11 = arith.mulf %3, %10 : vector<2x256xf32>
    %12 = vector.extract_strided_slice %11 {offsets = [0, 0], sizes = [1, 256], strides = [1, 1]} : vector<2x256xf32> to vector<1x256xf32>
    %c0_6 = arith.constant 0 : index
    %13 = memref.load %arg3[%c0_6] : memref<2xf32, #tpu.memory_space<smem>>
    %14 = vector.broadcast %13 : f32 to vector<1x256xf32>
    %15 = arith.addf %12, %14 : vector<1x256xf32>
    %c0_7 = arith.constant 0 : index
    %c0_8 = arith.constant 0 : index
    %16 = vector.load %arg4[%c0_7, %c0_8] : memref<2x256xf32, #tpu.memory_space<vmem>>, vector<1x256xf32>
    tpu.vector_store %arg4[%c0_7, %c0_8], %15 {strides = array<i32>} : memref<2x256xf32, #tpu.memory_space<vmem>>, vector<1x256xf32>,
    %17 = vector.extract_strided_slice %11 {offsets = [1, 0], sizes = [1, 256], strides = [1, 1]} : vector<2x256xf32> to vector<1x256xf32>
    %c1 = arith.constant 1 : index
    %18 = memref.load %arg3[%c1] : memref<2xf32, #tpu.memory_space<smem>>
    %19 = vector.broadcast %18 : f32 to vector<1x256xf32>
    %20 = arith.addf %17, %19 : vector<1x256xf32>
    %c1_9 = arith.constant 1 : index
    %c0_10 = arith.constant 0 : index
    %21 = vector.load %arg4[%c1_9, %c0_10] : memref<2x256xf32, #tpu.memory_space<vmem>>, vector<1x256xf32>
    tpu.vector_store %arg4[%c1_9, %c0_10], %20 {strides = array<i32>} : memref<2x256xf32, #tpu.memory_space<vmem>>, vector<1x256xf32>,
    return
  }
  func.func @transform_0(%arg0: i32) -> (i32, i32) {
    %c0_i32 = arith.constant 0 : i32
    %c0_i32_0 = arith.constant 0 : i32
    return %arg0, %c0_i32 : i32, i32
  }
  func.func @transform_1(%arg0: i32) -> (i32, i32) {
    %c0_i32 = arith.constant 0 : i32
    %c0_i32_0 = arith.constant 0 : i32
    %c0_i32_1 = arith.constant 0 : i32
    return %c0_i32, %c0_i32_0 : i32, i32
  }
  func.func @transform_2(%arg0: i32) -> i32 {
    %c0_i32 = arith.constant 0 : i32
    %c0_i32_0 = arith.constant 0 : i32
    return %c0_i32 : i32
  }
  func.func @transform_3(%arg0: i32) -> (i32, i32) {
    %c0_i32 = arith.constant 0 : i32
    %c0_i32_0 = arith.constant 0 : i32
    return %c0_i32, %arg0 : i32, i32
  }
}

</mosaic_0001>

<bundles_post_ra>
// kernel: tpu_custom_call.1
= control target key start
LH: loop header
LB: loop body
LE: loop exit
PB: predicated region body
PF: predicated region fallthrough
CT: control target
= control target key end

     0   :  { %8 = vsyncpa [#allocation4], 0  ;;  %s1483_s0 = inlined_call_operand.vmem [shape: bf16[512,32], index: 0, kind: input, shape index: {}]   ;;  %s1484_s1 = inlined_call_operand.vmem [shape: f32[2,32], index: 1, kind: input, shape index: {}]   ;;  %s1485_s2 = inlined_call_operand.vmem [shape: f32[2], index: 2, kind: input, shape index: {}]   ;;  %s1486_s3 = inlined_call_operand.hbm [shape: f32[2,512], index: 3, kind: output, shape index: {}]  }
   0x1   :  { %9 = vsyncpa [#allocation3], 0 }
   0x2   :  { %11 = vsyncpa [#allocation3 + $0x1], 0  ;;  %s1265_s12 = smov 0   ;;  %s1267_s13 = smov 0  }
   0x3   :  { %s1269_s14 = smov 0   ;;  %s1271_s15 = smov 0  }
   0x4 LB: > { %s1286_s16 = sadd.s32 4294967295, %s1239_s15   ;;  %s776_s17 = sadd.s32 4294967294, %s1239_s15   ;;  %s1239_s15 = sphi %s1271_s15, %s1495_s15   ;;  %s1235_s14 = sphi %s1269_s14, %s1494_s14   ;;  %s1231_s13 = sphi %s1267_s13, %s1493_s13   ;;  %s1227_s12 = sphi %s1265_s12, %s1492_s12  }
   0x5   : > { %s1290_s18 = sadd.s32 1, %s1239_s15   ;;  %s92_s19 = sadd.s32 1, %s1235_s14 }
   0x6   : > { %s89_s20 = ssub.s32 %s1239_s15, %s1290_s18  ;;  %p102_p0 = scmp.ne.s32.totalorder %s1235_s14, %s1231_s13 }
   0x7   : > { %p90_p1 = scmp.eq.s32.totalorder %s89_s20, 0  ;;  %p103_p2 = scmp.eq.s32.totalorder %s1286_s16, 1 }
   0x8   : > { %p108_p3 = scmp.ne.s32.totalorder %s1231_s13, %s1227_s12  ;;  %p109_p4 = scmp.eq.s32.totalorder %s776_s17, 1 }
   0x9   : > { %s1301_s21 = scalar_select %p90_p1, %s1235_s14, %s92_s19  }
   0xa   : > { %p1303_p5 = por %p103_p2, %p102_p0  ;;  %p1307_p6 = por %p109_p4, %p108_p3 }
   0xb   : > { %p777_p7 = scmp.ge.s32.totalorder %s1239_s15, 1  ;;  %p116_p8 = scmp.lt.s32.totalorder %s1239_s15, 3 }
   0xc   : > { %p1116_p9 = scmp.eq.s32.totalorder %s1286_s16, 0  ;;  %s132_s27 = sshll.u32 %s1485_s2, 4  ;;  %s133_s27 = int_to_ptr.vmem [resolvable:$true] %s132_s27 }
   0xd   : > { %p1314_p10 = pnand %p777_p7, %p116_p8  ;;  %s1158_s28 = scalar_lea.vmem %s133_s27, 16 }
   0xe   : > { %p1159_p13 = scmp.ne.s32.totalorder %s133_s27, %s1158_s28  ;;  %p1166_p3 = scmp.lt.s32.totalorder %s133_s27, %s133_s27 }
   0xf   : > { %p1108_p11 = pneg %p1314_p10  ;;  %p1167_p4 = scmp.lt.s32.totalorder %s1158_s28, %s1158_s28 }
  0x11   : > { %p1109_p12 = pnand %p1116_p9, %p1108_p11  ;;  %p1168_p7 = por %p1167_p4, %p1166_p3 }
  0x13   : > { %p1160_p0 = pneg %p1109_p12 }
  0x15   : > { %p1161_p1 = pnand %p1160_p0, %p1159_p13 }
  0x17   : > { %p1162_p2 = pneg %p1161_p1 }
  0x19   : > { %p1169_p8 = pnand %p1168_p7, %p1162_p2 }
  0x1b   : > { %1172 = shalt.err (!%p1169_p8)
}
  0x1c   : > { %s1241_s29 = smov [#allocation2]   ;;  %154 = sbr.rel (%p1314_p10) target bundleno = 369 (0x171), region = 32 }
  0x1d   : > { %1111 = dma.vmem_to_smem (!%p1109_p12), %s133_s27, 16, %s1241_s29, [#allocation4]  }
  0x23   : > { %1218 = dma.done.wait (%p1116_p9), [#allocation4], 16  }
  0x24   : > { %1220 = vsyncadd (%p1116_p9), [#allocation4], 4294967280 }
  0x25   : > { %160 = sfence }
  0x26   : > { %s783_s30 = sshll.u32 %s1286_s16, 5  ;;  %vm251_vm0 = vcmask 261120   ;;  %v1335_v0 = vld [vmem:[%s1484_s1] sm:$0x3]  ;;  %v1242_v1 = vmov 1.0   ;;  %s638_s10 = sld [smem:[#allocation2]] }
  0x27   : > { %p180_p11 = scmp.lt.s32.totalorder %s783_s30, 63  ;;  %1004 = vmatprep.mubr.msk.f32.mxu1 %vm251_vm0, %v1242_v1  ;;  %970 = vmatprep.mubr.msk.f32.mxu0 %vm251_vm0, %v1335_v0  ;;  %vm1348_vm1 = vmpackc.low %vm251_vm0, %vm251_vm0  ;;  %s851_s11 = sld [smem:[#allocation2 + $0x1]] }
  0x28   : > { %s176_s17 = sand.u32 1, %s1231_s13   ;;  %s858_s20 = sshll.u32 %s1286_s16, 6 }
  0x29   : > { %s1497_s30 = smov (!%p180_p11, %s783_s30), 63  ;;  %s782_s19 = sshll.u32 %s176_s17, 2 }
  0x2a   : > { %s784_s6 = sshll.u32 %s1497_s30, 2  ;;  %s178_s24 = scalar_lea.vmem [#allocation5], %s782_s19 }
  0x2b   : > { %s1344_s9 = scalar_lea.vmem %s1483_s0, %s784_s6  ;;  %s705_s25 = sshll.u32 %s178_s24, 4  ;;  %s1443_s25 = int_to_ptr.vmem [resolvable:$true] %s705_s25 }
  0x2c   : > { %v930_v3 = vld [vmem:[%s1344_s9 + $0x40] sm:$0xff]   ;;  %v931_v5 = vld [vmem:[%s1344_s9 + $0x48] sm:$0xff]   ;;  %v932_v13 = vld [vmem:[%s1344_s9 + $0x50] sm:$0xff]   ;;  %s1441_s28 = scalar_lea.hbm %s1486_s3, %s858_s20  ;;  %s691_s29 = scalar_lea.sflag [#allocation3], %s176_s17 }
  0x2d   : > { %v860_v4 = vld [vmem:[%s1344_s9] sm:$0xff]   ;;  %v893_v6 = vunpack.c.l.bf16 %v930_v3  ;;  %v894_v7 = vunpack.c.h.bf16 %v930_v3  ;;  %v923_v10 = vld [vmem:[%s1344_s9 + $0x8] sm:$0xff]   ;;  %1008 = vmatprep.subr.msk.bf16.mxu0 %vm1348_vm1, %v930_v3  ;;  %v897_v11 = vunpack.c.l.bf16 %v931_v5  ;;  %v898_v12 = vunpack.c.h.bf16 %v931_v5  ;;  %v924_v31 = vld [vmem:[%s1344_s9 + $0x10] sm:$0xff]   ;;  %s1173_s30 = scalar_lea.vmem %s1443_s25, 64  ;;  %s1244_s16 = smov [#allocation5]  }
  0x2e   : > { %v861_v8 = vunpack.c.l.bf16 %v860_v4  ;;  %v862_v9 = vunpack.c.h.bf16 %v860_v4  ;;  %1011 = vmatpush3.bf16.xpose.msk.msra.mxu0 %vm1348_vm1, %v860_v4  ;;  %v865_v20 = vunpack.c.l.bf16 %v923_v10  ;;  %v866_v21 = vunpack.c.h.bf16 %v923_v10  ;;  %v933_v32 = vld [vmem:[%s1344_s9 + $0x58] sm:$0xff]   ;;  %v934_v44 = vld [vmem:[%s1344_s9 + $0x60] sm:$0xff]   ;;  %v935_v56 = vld [vmem:[%s1344_s9 + $0x68] sm:$0xff]   ;;  %p1174_p9 = scmp.ne.s32.totalorder %s1443_s25, %s1173_s30  ;;  %s1177_s4 = sshll.u32 %s1244_s16, 4  ;;  %s1178_s4 = int_to_ptr.vmem [resolvable:$false] %s1177_s4 }
  0x2f   : > { %v438_v14 = vmul.f32 %v893_v6, %v893_v6  ;;  %v439_v15 = vmul.f32 %v894_v7, %v894_v7  ;;  %1014 = vmatprep.subr.msk.bf16.mxu0 %vm1348_vm1, %v931_v5  ;;  %v440_v18 = vmul.f32 %v897_v11, %v897_v11  ;;  %v441_v19 = vmul.f32 %v898_v12, %v898_v12  ;;  %v925_v43 = vld [vmem:[%s1344_s9 + $0x18] sm:$0xff]   ;;  %v926_v55 = vld [vmem:[%s1344_s9 + $0x20] sm:$0xff]   ;;  %v927_v6 = vld [vmem:[%s1344_s9 + $0x28] sm:$0xff]   ;;  %s1179_s5 = scalar_lea.vmem %s1178_s4, 128  ;;  %p1180_p13 = scmp.lt.s32.totalorder %s1443_s25, %s1178_s4 }
  0x30   : > { %v422_v16 = vmul.f32 %v861_v8, %v861_v8  ;;  %v423_v17 = vmul.f32 %v862_v9, %v862_v9  ;;  %v901_v24 = vunpack.c.l.bf16 %v932_v13  ;;  %v902_v25 = vunpack.c.h.bf16 %v932_v13  ;;  %v936_v7 = vld [vmem:[%s1344_s9 + $0x70] sm:$0xff]   ;;  %p1175_p10 = pnand %p1174_p9, %p1303_p5  ;;  %p1181_p0 = scmp.lt.s32.totalorder %s1179_s5, %s1173_s30 }
  0x31   : > { %v1054_v22 = vpack.c.bf16 %v439_v15, %v438_v14  ;;  %v1060_v26 = vpack.c.bf16 %v441_v19, %v440_v18  ;;  %v424_v27 = vmul.f32 %v865_v20, %v865_v20  ;;  %v425_v28 = vmul.f32 %v866_v21, %v866_v21  ;;  %v928_v18 = vld [vmem:[%s1344_s9 + $0x30] sm:$0xff]   ;;  %v937_v19 = vld [vmem:[%s1344_s9 + $0x78] sm:$0xff]  }
  0x32   : > { %v1057_v23 = vpack.c.bf16 %v423_v17, %v422_v16  ;;  %v442_v29 = vmul.f32 %v901_v24, %v901_v24  ;;  %v443_v30 = vmul.f32 %v902_v25, %v902_v25  ;;  %v869_v34 = vunpack.c.l.bf16 %v924_v31  ;;  %p1176_p12 = pneg %p1175_p10  ;;  %p1182_p1 = por %p1181_p0, %p1180_p13 }
  0x33   : > { %1056 = vmatprep.subr.msk.bf16.mxu1 %vm1348_vm1, %v1054_v22  ;;  %v1063_v33 = vpack.c.bf16 %v425_v28, %v424_v27  ;;  %v870_v35 = vunpack.c.h.bf16 %v924_v31  ;;  %v905_v37 = vunpack.c.l.bf16 %v933_v32  ;;  %v906_v38 = vunpack.c.h.bf16 %v933_v32 }
  0x34   : > { %1059 = vmatpush3.bf16.xpose.msk.msra.mxu1 %vm1348_vm1, %v1057_v23  ;;  %v1066_v36 = vpack.c.bf16 %v443_v30, %v442_v29  ;;  %v426_v39 = vmul.f32 %v869_v34, %v869_v34  ;;  %v873_v46 = vunpack.c.l.bf16 %v925_v43  ;;  %v874_v47 = vunpack.c.h.bf16 %v925_v43  ;;  %v929_v30 = vld [vmem:[%s1344_s9 + $0x38] sm:$0xff]   ;;  %p1183_p2 = pnand %p1182_p1, %p1176_p12 }
  0x35   : > { %1062 = vmatprep.subr.msk.bf16.mxu1 %vm1348_vm1, %v1060_v26  ;;  %v427_v40 = vmul.f32 %v870_v35, %v870_v35  ;;  %v444_v41 = vmul.f32 %v905_v37, %v905_v37  ;;  %v445_v42 = vmul.f32 %v906_v38, %v906_v38  ;;  %v909_v49 = vunpack.c.l.bf16 %v934_v44 }
  0x36   : > { %1017 = vmatpush3.bf16.xpose.msk.msra.mxu0 %vm1348_vm1, %v923_v10  ;;  %v910_v50 = vunpack.c.h.bf16 %v934_v44  ;;  %v428_v51 = vmul.f32 %v873_v46, %v873_v46  ;;  %v429_v52 = vmul.f32 %v874_v47, %v874_v47  ;;  %v877_v58 = vunpack.c.l.bf16 %v926_v55 }
  0x37   : > { %1020 = vmatprep.subr.msk.bf16.mxu0 %vm1348_vm1, %v932_v13  ;;  %v1069_v45 = vpack.c.bf16 %v427_v40, %v426_v39  ;;  %v1072_v48 = vpack.c.bf16 %v445_v42, %v444_v41  ;;  %v446_v53 = vmul.f32 %v909_v49, %v909_v49  ;;  %v878_v59 = vunpack.c.h.bf16 %v926_v55 }
  0x38   : > { %v447_v54 = vmul.f32 %v910_v50, %v910_v50  ;;  %v1075_v57 = vpack.c.bf16 %v429_v52, %v428_v51  ;;  %v913_v61 = vunpack.c.l.bf16 %v935_v56  ;;  %v914_v62 = vunpack.c.h.bf16 %v935_v56 }
  0x39   : > { %v430_v63 = vmul.f32 %v877_v58, %v877_v58  ;;  %v431_v3 = vmul.f32 %v878_v59, %v878_v59  ;;  %v881_v9 = vunpack.c.l.bf16 %v927_v6  ;;  %v882_v10 = vunpack.c.h.bf16 %v927_v6 }
  0x3a   : > { %v1078_v60 = vpack.c.bf16 %v447_v54, %v446_v53  ;;  %v448_v4 = vmul.f32 %v913_v61, %v913_v61  ;;  %v449_v5 = vmul.f32 %v914_v62, %v914_v62  ;;  %v917_v12 = vunpack.c.l.bf16 %v936_v7 }
  0x3b   : > { %v1081_v8 = vpack.c.bf16 %v431_v3, %v430_v63  ;;  %v918_v13 = vunpack.c.h.bf16 %v936_v7  ;;  %v432_v14 = vmul.f32 %v881_v9, %v881_v9  ;;  %v433_v15 = vmul.f32 %v882_v10, %v882_v10 }
  0x3c   : > { %1065 = vmatpush3.bf16.xpose.msk.msra.mxu1 %vm1348_vm1, %v1063_v33  ;;  %v1084_v11 = vpack.c.bf16 %v449_v5, %v448_v4  ;;  %v450_v16 = vmul.f32 %v917_v12, %v917_v12  ;;  %v885_v21 = vunpack.c.l.bf16 %v928_v18  ;;  %v886_v22 = vunpack.c.h.bf16 %v928_v18 }
  0x3d   : > { %1068 = vmatprep.subr.msk.bf16.mxu1 %vm1348_vm1, %v1066_v36  ;;  %v451_v17 = vmul.f32 %v918_v13, %v918_v13  ;;  %v1087_v20 = vpack.c.bf16 %v433_v15, %v432_v14  ;;  %v921_v24 = vunpack.c.l.bf16 %v937_v19  ;;  %v922_v25 = vunpack.c.h.bf16 %v937_v19 }
  0x3e   : > { %1023 = vmatpush3.bf16.xpose.msk.msra.mxu0 %vm1348_vm1, %v924_v31  ;;  %v434_v26 = vmul.f32 %v885_v21, %v885_v21  ;;  %v435_v27 = vmul.f32 %v886_v22, %v886_v22  ;;  %v890_v33 = vunpack.c.h.bf16 %v929_v30  ;;  %v1243_v46 = vmov 1966171168  }
  0x3f   : > { %1026 = vmatprep.subr.msk.bf16.mxu0 %vm1348_vm1, %v933_v32  ;;  %v1090_v23 = vpack.c.bf16 %v451_v17, %v450_v16  ;;  %v452_v28 = vmul.f32 %v921_v24, %v921_v24  ;;  %v453_v29 = vmul.f32 %v922_v25, %v922_v25  ;;  %v889_v32 = vunpack.c.l.bf16 %v929_v30 }
  0x40   : > { %v1093_v31 = vpack.c.bf16 %v435_v27, %v434_v26  ;;  %v437_v36 = vmul.f32 %v890_v33, %v890_v33  ;;  %v646_v47 = vunpack.c.l.s4 %v1243_v46  ;;  %v666_v51 = vstv %s851_s11 }
  0x41   : > { %v1096_v34 = vpack.c.bf16 %v453_v29, %v452_v28  ;;  %v436_v35 = vmul.f32 %v889_v32, %v889_v32 }
  0x42   : > { %v647_v50 = vunpack.c.0.s8 %v646_v47 }
  0x43   : > { %v1099_v37 = vpack.c.bf16 %v437_v36, %v436_v35 }
  0x44   : > { %1071 = vmatpush3.bf16.xpose.msk.msra.mxu1 %vm1348_vm1, %v1069_v45 }
  0x45   : > { %1074 = vmatprep.subr.msk.bf16.mxu1 %vm1348_vm1, %v1072_v48 }
  0x46   : > { %1029 = vmatpush3.bf16.xpose.msk.msra.mxu0 %vm1348_vm1, %v925_v43 }
  0x47   : > { %1032 = vmatprep.subr.msk.bf16.mxu0 %vm1348_vm1, %v934_v44  ;;  %v628_v44 = vlaneseq }
  0x49   : > { %v629_v45 = vshrl.u32 %v628_v44, 7  ;;  %vm662_vm2 = vcmp.lt.s32.totalorder %v628_v44, 256 }
  0x4b   : > { %v630_v2 = vsub.s32 0, %v629_v45 }
  0x4c   : > { %1077 = vmatpush3.bf16.xpose.msk.msra.mxu1 %vm1348_vm1, %v1075_v57  ;;  %v650_v57 = vsub.s32 %v647_v50, %v629_v45 }
  0x4d   : > { %1080 = vmatprep.subr.msk.bf16.mxu1 %vm1348_vm1, %v1078_v60 }
  0x4e   : > { %1035 = vmatpush3.bf16.xpose.msk.msra.mxu0 %vm1348_vm1, %v926_v55 }
  0x4f   : > { %1038 = vmatprep.subr.msk.bf16.mxu0 %vm1348_vm1, %v935_v56 }
  0x54   : > { %1083 = vmatpush3.bf16.xpose.msk.msra.mxu1 %vm1348_vm1, %v1081_v8 }
  0x55   : > { %1086 = vmatprep.subr.msk.bf16.mxu1 %vm1348_vm1, %v1084_v11 }
  0x56   : > { %1041 = vmatpush3.bf16.xpose.msk.msra.mxu0 %vm1348_vm1, %v927_v6 }
  0x57   : > { %1044 = vmatprep.subr.msk.bf16.mxu0 %vm1348_vm1, %v936_v7 }
  0x5c   : > { %1089 = vmatpush3.bf16.xpose.msk.msra.mxu1 %vm1348_vm1, %v1087_v20 }
  0x5d   : > { %1092 = vmatprep.subr.msk.bf16.mxu1 %vm1348_vm1, %v1090_v23 }
  0x5e   : > { %1047 = vmatpush3.bf16.xpose.msk.msra.mxu0 %vm1348_vm1, %v928_v18 }
  0x5f   : > { %1050 = vmatprep.subr.msk.bf16.mxu0 %vm1348_vm1, %v937_v19 }
  0x64   : > { %1095 = vmatpush3.bf16.xpose.msk.msra.mxu1 %vm1348_vm1, %v1093_v31 }
  0x65   : > { %1098 = vmatprep.subr.msk.bf16.mxu1 %vm1348_vm1, %v1096_v34 }
  0x66   : > { %1053 = vmatpush3.bf16.xpose.msk.msra.mxu0 %vm1348_vm1, %v929_v30 }
  0x6c   : > { %1101 = vmatpush3.bf16.xpose.msk.msra.mxu1 %vm1348_vm1, %v1099_v37 }
  0x6d   : > { %971 = vmatmul.mubr.msk.f32.vlgmr.msra.gmra.mrb[0].mxu0 %vm251_vm0, %v1335_v0 }
  0x73   : > { %1005 = vmatmul.mubr.msk.f32.vlgmr.msra.gmra.mrb[0].mxu1 %vm251_vm0, %v1242_v1  ;;  %v639_v1 = vstv %s638_s10 }
 0x140   : > { %v417_v38 = vpop.f32.mrb[0].mxu0 }
 0x141   : > { %v419_v39 = vpop.f32.mrb[1].mxu0 }
 0x146   : > { %v619_v40 = vpop.f32.mrb[0].mxu1 }
 0x147   : > { %v624_v41 = vmax.f32 %v619_v40, 1e-24  ;;  %v621_v42 = vpop.f32.mrb[1].mxu1 }
 0x148   : > { %v625_v43 = vmax.f32 %v621_v42, 1e-24 }
 0x149   : > { %1154 = vrsqrt.f32 %v624_v41 }
 0x14a   : > { %1156 = vrsqrt.f32 %v625_v43 }
 0x153   : > { %v1155_v0 = vpop.eup %1154 }
 0x154   : > { %v1157_v48 = vpop.eup %1156  ;;  %v631_v49 = vrot.slane %v1155_v0, %v630_v2 }
 0x155   : > { %v635_v52 = vrot.slane %v1157_v48, %v630_v2 }
 0x156   : > { %v636_v53 = vmul.f32 %v631_v49, %v417_v38 }
 0x157   : > { %v637_v54 = vmul.f32 %v635_v52, %v419_v39 }
 0x158   : > { %v640_v55 = vadd.f32 %v639_v1, %v636_v53  ;;  %v667_v56 = vadd.f32 %v666_v51, %v636_v53 }
 0x159   : > { %v641_v58 = vadd.f32 %v639_v1, %v637_v54  ;;  %v668_v59 = vadd.f32 %v666_v51, %v637_v54 }
 0x15b   : > { %v644_v60 = vcombine.low %v640_v55, %v641_v58  ;;  %v671_v61 = vcombine.low %v667_v56, %v668_v59 }
 0x15d   : > { %v651_v62 = vrot.slane %v644_v60, %v650_v57  ;;  %v678_v63 = vrot.slane %v671_v61, %v650_v57 }
 0x15f   : > { %v658_v3 = vrot.slane %v651_v62, %v650_v57  ;;  %v679_v4 = vcombine.high %v678_v63, %v678_v63 }
 0x161   : > { %v686_v5 = vrot.slane %v679_v4, %v650_v57  ;;  %664 = vst.msk [vmem:[%s178_s24] ss:$2 sm:$0x3] %vm662_vm2, %v658_v3 }
 0x163   : > { %852 = vst.msk [vmem:[%s178_s24 + $0x1] ss:$2 sm:$0x3] %vm662_vm2, %v686_v5 }
 0x164   : > { %1186 = shalt.err (!%p1183_p2)
}
 0x165   : > { %s1187_s6 = scalar_lea.hbm %s1441_s28, 64  ;;  %s1191_s9 = scalar_lea.hbm %s1486_s3, 128 }
 0x166   : > { %p1188_p3 = scmp.ne.s32.totalorder %s1441_s28, %s1187_s6  ;;  %p1192_p8 = scmp.lt.u32.totalorder %s1441_s28, %s1486_s3 }
 0x167   : > { %p1193_p11 = scmp.lt.u32.totalorder %s1191_s9, %s1187_s6  ;;  %p1195_p10 = scmp.lt.u32.totalorder %s1187_s6, %s1441_s28 }
 0x168   : > { %p1189_p4 = pnand %p1188_p3, %p1303_p5 }
 0x169   : > { %p1194_p9 = por %p1193_p11, %p1192_p8 }
 0x16a   : > { %p1190_p7 = pneg %p1189_p4 }
 0x16b   : > { %p1196_p12 = por %p1195_p10, %p1194_p9 }
 0x16d   : > { %p1197_p13 = pnand %p1196_p12, %p1190_p7 }
 0x16f   : > { %1200 = shalt.err (!%p1197_p13)
}
 0x170   : > { %1106 = dma.vmem_to_hbm [thread:$0]  (%p1303_p5), %s1443_s25, 64, %s1441_s28, %s691_s29  }
 0x171 PF: > { %p1118_p0 = scmp.ge.s32.totalorder %s1239_s15, 2  ;;  %s717_s17 = sand.u32 1, %s1227_s12  }
 0x172   : > { %s718_s19 = scalar_lea.sflag [#allocation3], %s717_s17 }
 0x173   : > { %p1113_p1 = pnand %p1118_p0, %p1307_p6 }
 0x175   : > { %1222 = dma.done.wait (!%p1113_p1), %s718_s19, 64  }
 0x176   : > { %1224 = vsyncadd (!%p1113_p1), %s718_s19, 4294967232  ;;  %p14_p2 = scmp.ge.s32.totalorder %s1290_s18, 4   ;;  %s1492_s12 = smov %s1231_s13 }
 0x177   : > { %s1493_s13 = smov %s1235_s14  ;;  %s1494_s14 = smov %s1301_s21 }
 0x178   : > { %s1495_s15 = smov %s1290_s18  ;;  %16 = sbr.rel (!%p14_p2) target bundleno = 4 (0x4), region = 73 }
 0x17f   :  { %723 = vsyncpa [#allocation3], 1 }
 0x180   :  { %725 = vsyncpa [#allocation3 + $0x1], 1 }
 0x181   :  { %726 = vsyncpa [#allocation4], 1 }
 0x182   :  { %728 = vsyncpa [#allocation4 + $0x1], 1 }

</bundles_post_ra>
